<compile_context>
chip_gen: v7x
topology: tpu7x:2x2x1
jax: 0.10.0
libtpu: 0.0.40
codegen_flags: <defaults>
</compile_context>

<pallas_src>
import jax
import jax.numpy as jnp
from jax.experimental import pallas as pl
from jax.experimental.pallas import tpu as pltpu


def _round_up(x, m):
    return ((x + m - 1) // m) * m


def _linear_kernel(x_ref, w_ref, b_ref, o_ref):
    # x_ref: (TM, K), w_ref: (K, TN), b_ref: (1, TN) f32, o_ref: (TM, TN)
    x = x_ref[...]
    if x.dtype != w_ref.dtype:
        # In-kernel cast (VPU, hidden under DMA) instead of a wrapper-side
        # cast that would write+re-read a copy of x in HBM.
        x = x.astype(w_ref.dtype)
    acc = jnp.dot(x, w_ref[...], preferred_element_type=jnp.float32)
    o_ref[...] = (acc + b_ref[...]).astype(o_ref.dtype)


def _select_tiles(M, N, K, x_isz, w_isz, out_isz, sublane, budget):
    """Returns (TM, TN, full_weight_resident)."""

    def footprint(tm, tn):
        # Double-buffered x / w / bias / out tiles (bias kept in f32).
        return 2 * (tm * K * x_isz + K * tn * w_isz + tn * 4 + tm * tn * out_isz)

    tm_cap = _round_up(M, sublane)
    tms = [t for t in (1024, 512, 256) if t <= tm_cap] or [tm_cap]

    # Path A: full-width weight resident, 1-D grid over M (preferred).
    for tm in tms:
        if footprint(tm, N) <= budget:
            return tm, N, True

    # Path B: tile N too (256-aligned for the 256-wide v6e/v7x MXU),
    # 2-D grid with M outer so the activation tile is the resident operand.
    for tm in tms:
        for tn in (512, 256):
            if footprint(tm, tn) <= budget:
                return tm, tn, False
    return tms[-1], 256, False  # last resort; still correct


def linear_projection(x, weight, bias, *, compute_dtype=None, force_pallas=False):
    """x: (B, n_patches, patch_dim); weight: (dim, patch_dim); bias: (dim,)."""
    B, P, K = x.shape
    N = weight.shape[0]
    M = B * P
    out_dtype = x.dtype

    # NOTE: in a real model, pre-transpose / pre-cast the weight once as a
    # cached parameter instead of per call (it is tiny, so this is cheap).
    w_t = weight.T  # (K, N)
    if compute_dtype is not None:
        w_t = w_t.astype(compute_dtype)
    b2d = bias.reshape(1, N).astype(jnp.float32)

    x2d = x.reshape(M, K)

    # Small-shape fast path: pallas_call fixed cost dwarfs compute here.
    if not force_pallas and (2 * M * K * N) < (1 << 19):
        y = jnp.dot(x2d.astype(w_t.dtype), w_t,
                    preferred_element_type=jnp.float32) + b2d
        return y.astype(out_dtype).reshape(B, P, N)

    x_isz = jnp.dtype(x2d.dtype).itemsize
    w_isz = jnp.dtype(w_t.dtype).itemsize
    out_isz = jnp.dtype(out_dtype).itemsize
    sublane = 16 if min(x_isz, out_isz) == 2 else 8

    # Working-set budget: comfortably inside v7x's 64 MiB VMEM per TC, and
    # small relative to the 128 MiB on v5e/v6e.
    VMEM_BUDGET = 40 * 1024 * 1024
    TM, TN, full_weight = _select_tiles(M, N, K, x_isz, w_isz, out_isz,
                                        sublane, VMEM_BUDGET)

    gM = pl.cdiv(M, TM)

    if full_weight:
        # 1-D grid over M; (K, N) weight slab + bias stay resident in VMEM.
        grid = (gM,)
        in_specs = [
            pl.BlockSpec((TM, K), lambda i: (i, 0)),   # activations (streamed once)
            pl.BlockSpec((K, N), lambda i: (0, 0)),    # full weight, resident
            pl.BlockSpec((1, N), lambda i: (0, 0)),    # bias, resident
        ]
        out_specs = pl.BlockSpec((TM, N), lambda i: (i, 0))
        dim_sem = ("parallel",)
    else:
        # 2-D grid, M outer: activation tile resident across inner N steps;
        # only the small (K, TN) weight slab is re-DMA'd.
        gN = pl.cdiv(N, TN)
        grid = (gM, gN)
        in_specs = [
            pl.BlockSpec((TM, K), lambda i, j: (i, 0)),
            pl.BlockSpec((K, TN), lambda i, j: (0, j)),
            pl.BlockSpec((1, TN), lambda i, j: (0, j)),
        ]
        out_specs = pl.BlockSpec((TM, TN), lambda i, j: (i, j))
        dim_sem = ("parallel", "parallel")

    # Accurate double-buffered footprint -> modest headroom, capped at 48 MiB.
    fp = 2 * (TM * K * x_isz + K * TN * w_isz + TN * 4 + TM * TN * out_isz)
    vmem_limit = int(min(48 * 1024 * 1024,
                         max(8 * 1024 * 1024, fp + fp // 2 + (1 << 20))))

    cost = pl.CostEstimate(
        flops=2 * M * K * N,
        transcendentals=0,
        bytes_accessed=(M * K * x_isz + K * N * w_isz + N * 4 + M * N * out_isz),
    )

    out2d = pl.pallas_call(
        _linear_kernel,
        out_shape=jax.ShapeDtypeStruct((M, N), out_dtype),
        grid_spec=pltpu.PrefetchScalarGridSpec(
            num_scalar_prefetch=0,
            grid=grid,
            in_specs=in_specs,
            out_specs=out_specs,
        ),
        compiler_params=pltpu.CompilerParams(
            dimension_semantics=dim_sem,
            vmem_limit_bytes=vmem_limit,
        ),
        cost_estimate=cost,
    )(x2d, w_t, b2d)

    return out2d.reshape(B, P, N)


if __name__ == "__main__":
    key = jax.random.PRNGKey(0)
    kx, kw, kb = jax.random.split(key, 3)

    # Small shapes consistent with the module: batch=2, n_patches=8,
    # patch_dim=32, dim=32.
    batch, n_patches, patch_dim, dim = 2, 8, 32, 32
    x = jax.random.normal(kx, (batch, n_patches, patch_dim), dtype=jnp.float32)
    bound = 1.0 / (patch_dim ** 0.5)
    weight = jax.random.uniform(kw, (dim, patch_dim), jnp.float32, -bound, bound)
    bias = jax.random.uniform(kb, (dim,), jnp.float32, -bound, bound)

    y_ref = x @ weight.T + bias

    # 1) Pallas path (forced; these shapes would otherwise hit the fast path).
    y = linear_projection(x, weight, bias, force_pallas=True)
    jax.block_until_ready(y)
    assert y.shape == (batch, n_patches, dim)
    assert jnp.allclose(y, y_ref, atol=1e-5, rtol=1e-5)

    # 2) Ragged / non-128-aligned shapes exercise masked edge tiles (no padding).
    b2, p2, k2, d2 = 2, 50, 48, 96
    x2 = jax.random.normal(kx, (b2, p2, k2), dtype=jnp.float32)
    w2 = jax.random.uniform(kw, (d2, k2), jnp.float32, -0.1, 0.1)
    bi2 = jax.random.uniform(kb, (d2,), jnp.float32, -0.1, 0.1)
    y2 = linear_projection(x2, w2, bi2, force_pallas=True)
    jax.block_until_ready(y2)
    assert jnp.allclose(y2, x2 @ w2.T + bi2, atol=1e-5, rtol=1e-5)

    # 3) bf16 MXU compute path (looser tolerance).
    y3 = linear_projection(x, weight, bias, compute_dtype=jnp.bfloat16,
                           force_pallas=True)
    jax.block_until_ready(y3)
    assert jnp.allclose(y3, y_ref, atol=3e-2, rtol=3e-2)

    # 4) Default tiny-shape fast path (plain XLA GEMM).
    y4 = linear_projection(x, weight, bias)
    jax.block_until_ready(y4)
    assert jnp.allclose(y4, y_ref, atol=1e-5, rtol=1e-5)

    print("KERNEL_OK")
</pallas_src>

<mosaic_0001>
module attributes {stable_mosaic.version = 11 : i64} {
  func.func @_linear_kernel(%arg0: i32, %arg1: memref<16x32xf32, #tpu.memory_space<vmem>>, %arg2: memref<32x32xf32, #tpu.memory_space<vmem>>, %arg3: memref<1x32xf32, #tpu.memory_space<vmem>>, %arg4: memref<16x32xf32, #tpu.memory_space<vmem>>) attributes {dimension_semantics = [#tpu.dimension_semantics<parallel>], iteration_bounds = array<i64: 1>, scalar_prefetch = 0 : i64, scratch_operands = 0 : i64, tpu.core_type = #tpu.core_type<tc>, window_params = [{transform_indices = @transform_0, window_bounds = array<i64: 16, 32>}, {pipeline_mode = #tpu.pipeline_mode<synchronous>, transform_indices = @transform_1, window_bounds = array<i64: 32, 32>}, {pipeline_mode = #tpu.pipeline_mode<synchronous>, transform_indices = @transform_2, window_bounds = array<i64: 1, 32>}, {transform_indices = @transform_3, window_bounds = array<i64: 16, 32>}]} {
    %c0 = arith.constant 0 : index
    %c0_0 = arith.constant 0 : index
    %0 = vector.load %arg1[%c0, %c0_0] : memref<16x32xf32, #tpu.memory_space<vmem>>, vector<16x32xf32>
    %c0_1 = arith.constant 0 : index
    %c0_2 = arith.constant 0 : index
    %1 = vector.load %arg2[%c0_1, %c0_2] : memref<32x32xf32, #tpu.memory_space<vmem>>, vector<32x32xf32>
    %cst = arith.constant dense<0.000000e+00> : vector<16x32xf32>
    %2 = tpu.matmul %0, %1, %cst {dimension_numbers = #tpu.dot_dimension_numbers<[1], [0], [0], [1], [0, 0, 1, 1], [], []>} : vector<16x32xf32>, vector<32x32xf32>, vector<16x32xf32> -> vector<16x32xf32>
    %c0_3 = arith.constant 0 : index
    %c0_4 = arith.constant 0 : index
    %3 = vector.load %arg3[%c0_3, %c0_4] : memref<1x32xf32, #tpu.memory_space<vmem>>, vector<1x32xf32>
    %4 = vector.broadcast %3 : vector<1x32xf32> to vector<16x32xf32>
    %5 = arith.addf %2, %4 : vector<16x32xf32>
    %c0_5 = arith.constant 0 : index
    %c0_6 = arith.constant 0 : index
    %6 = vector.load %arg4[%c0_5, %c0_6] : memref<16x32xf32, #tpu.memory_space<vmem>>, vector<16x32xf32>
    tpu.vector_store %arg4[%c0_5, %c0_6], %5 {strides = array<i32>} : memref<16x32xf32, #tpu.memory_space<vmem>>, vector<16x32xf32>,
    return
  }
  func.func @transform_0(%arg0: i32) -> (i32, i32) {
    %c0_i32 = arith.constant 0 : i32
    %c0_i32_0 = arith.constant 0 : i32
    return %arg0, %c0_i32 : i32, i32
  }
  func.func @transform_1(%arg0: i32) -> (i32, i32) {
    %c0_i32 = arith.constant 0 : i32
    %c0_i32_0 = arith.constant 0 : i32
    %c0_i32_1 = arith.constant 0 : i32
    return %c0_i32, %c0_i32_0 : i32, i32
  }
  func.func @transform_2(%arg0: i32) -> (i32, i32) {
    %c0_i32 = arith.constant 0 : i32
    %c0_i32_0 = arith.constant 0 : i32
    %c0_i32_1 = arith.constant 0 : i32
    return %c0_i32, %c0_i32_0 : i32, i32
  }
  func.func @transform_3(%arg0: i32) -> (i32, i32) {
    %c0_i32 = arith.constant 0 : i32
    %c0_i32_0 = arith.constant 0 : i32
    return %arg0, %c0_i32 : i32, i32
  }
}

</mosaic_0001>

<bundles_post_ra>
// kernel: tpu_custom_call.1
= control target key start
LH: loop header
LB: loop body
LE: loop exit
PB: predicated region body
PF: predicated region fallthrough
CT: control target
= control target key end

     0   :  { %8 = vsyncpa [#allocation3], 0  ;;  %s340_s0 = inlined_call_operand.hbm [shape: f32[16,32], index: 0, kind: input, shape index: {}]   ;;  %s341_s1 = inlined_call_operand.hbm [shape: f32[32,32], index: 1, kind: input, shape index: {}]   ;;  %s342_s2 = inlined_call_operand.vmem [shape: f32[1,32], index: 2, kind: input, shape index: {}]   ;;  %s343_s3 = inlined_call_operand.hbm [shape: f32[16,32], index: 3, kind: output, shape index: {}]  }
   0x1   :  { %9 = vsyncpa [#allocation6], 0 }
   0x2   :  { %10 = vsyncpa [#allocation4], 0  ;;  %s263_s12 = smov [#allocation2]   ;;  %s191_s16 = scalar_lea.hbm %s340_s0, 256 }
   0x3   :  { %s16_s13 = sshll.u32 %s263_s12, 4  ;;  %p192_p0 = scmp.ne.s32.totalorder %s340_s0, %s191_s16  ;;  %s17_s13 = int_to_ptr.vmem [resolvable:$true] %s16_s13 }
   0x4   :  { %p195_p1 = scmp.lt.u32.totalorder %s191_s16, %s340_s0 }
   0x6   :  { %p197_p2 = pnand %p195_p1, %p192_p0 }
   0x8   :  { %200 = shalt.err (!%p197_p2)
}
   0x9   :  { %s201_s21 = scalar_lea.vmem %s17_s13, 256  ;;  %p206_p4 = scmp.lt.s32.totalorder %s17_s13, %s17_s13 }
   0xa   :  { %p202_p3 = scmp.ne.s32.totalorder %s17_s13, %s201_s21  ;;  %p207_p5 = scmp.lt.s32.totalorder %s201_s21, %s201_s21 }
   0xc   :  { %p208_p6 = por %p207_p5, %p206_p4 }
   0xe   :  { %p209_p7 = pnand %p208_p6, %p202_p3 }
  0x10   :  { %212 = shalt.err (!%p209_p7)
}
  0x11   :  { %s264_s22 = smov 128   ;;  %s265_s23 = smov 8  }
  0x12   :  { %22 = dma.hbm_to_vmem [thread:$0]  %s340_s0, 256, %s17_s13, [#allocation3], %s264_s22, %s264_s22, %s265_s23  }
  0x13   :  { %s266_s26 = smov [#allocation5]   ;;  %s213_s30 = scalar_lea.hbm %s341_s1, 512 }
  0x14   :  { %s28_s27 = sshll.u32 %s266_s26, 4  ;;  %p214_p8 = scmp.ne.s32.totalorder %s341_s1, %s213_s30  ;;  %s29_s27 = int_to_ptr.vmem [resolvable:$true] %s28_s27 }
  0x15   :  { %p217_p9 = scmp.lt.u32.totalorder %s213_s30, %s341_s1 }
  0x17   :  { %p219_p10 = pnand %p217_p9, %p214_p8 }
  0x19   :  { %222 = shalt.err (!%p219_p10)
}
  0x1a   :  { %s223_s8 = scalar_lea.vmem %s29_s27, 512  ;;  %p228_p12 = scmp.lt.s32.totalorder %s29_s27, %s29_s27 }
  0x1b   :  { %p224_p11 = scmp.ne.s32.totalorder %s29_s27, %s223_s8  ;;  %p229_p13 = scmp.lt.s32.totalorder %s223_s8, %s223_s8 }
  0x1d   :  { %p230_p0 = por %p229_p13, %p228_p12 }
  0x1f   :  { %p231_p1 = pnand %p230_p0, %p224_p11 }
  0x21   :  { %234 = shalt.err (!%p231_p1)
}
  0x22   :  { %34 = dma.hbm_to_vmem [thread:$0]  %s341_s1, 512, %s29_s27, [#allocation6], %s264_s22, %s264_s22, %s265_s23  }
  0x23   :  { %257 = dma.done.wait [#allocation3], 256  }
  0x24   :  { %258 = vsyncadd [#allocation3], 4294967040 }
  0x25   :  { %259 = dma.done.wait [#allocation6], 512  }
  0x26   :  { %260 = vsyncadd [#allocation6], 4294966784  ;;  %vm56_vm0 = vcmask 261120   ;;  %v45_v0 = vld [vmem:[#allocation5] sm:$0xff]  ;;  %v46_v1 = vld [vmem:[#allocation5 + $0x8] sm:$0xff]  ;;  %s267_s11 = smov [#allocation7]  }
  0x27   :  { %v47_v2 = vld [vmem:[#allocation5 + $0x10] sm:$0xff]  ;;  %v178_v3 = vpack.c.bf16 %v46_v1, %v45_v0  ;;  %v48_v4 = vld [vmem:[#allocation5 + $0x18] sm:$0xff]  ;;  %s145_s12 = sshll.u32 %s267_s11, 4  ;;  %s146_s12 = int_to_ptr.vmem [resolvable:$true] %s145_s12 }
  0x28   :  { %v43_v5 = vld [vmem:[#allocation2] sm:$0xff]  ;;  %v182_v6 = vpack.c.bf16 %v48_v4, %v47_v2  ;;  %v44_v7 = vld [vmem:[#allocation2 + $0x8] sm:$0xff]  ;;  %s235_s13 = scalar_lea.vmem %s146_s12, 256  ;;  %p240_p3 = scmp.lt.s32.totalorder %s146_s12, %s146_s12 }
  0x29   :  { %175 = vmatprep.mubr.msk.f32.mxu0 %vm56_vm0, %v43_v5  ;;  %179 = vmatprep.subr.bf16.mxu0 %v178_v3  ;;  %v158_v8 = vld [vmem:[%s342_s2] ss:$0 sm:$0xff]  ;;  %p236_p2 = scmp.ne.s32.totalorder %s146_s12, %s235_s13  ;;  %p241_p4 = scmp.lt.s32.totalorder %s235_s13, %s235_s13 }
  0x2a   :  { %181 = vmatpush3.bf16.msra.mxu0 %v178_v3 }
  0x2b   :  { %183 = vmatprep.subr.bf16.mxu0 %v182_v6  ;;  %p242_p5 = por %p241_p4, %p240_p3 }
  0x2d   :  { %p243_p6 = pnand %p242_p5, %p236_p2 }
  0x2e   :  { %185 = vmatpush3.bf16.msra.mxu0 %v182_v6 }
  0x31   :  { %176 = vmatmul.mubr.msk.f32.vlgmr.msra.gmra.mrb[0].mxu0 %vm56_vm0, %v44_v7 }
 0x104   :  { %v177_v9 = vpop.f32.mrb[0].mxu0 }
 0x105   :  { %v135_v10 = vadd.f32 %v177_v9, %v158_v8  ;;  %v129_v11 = vpop.f32.mrb[1].mxu0 }
 0x106   :  { %v130_v12 = vadd.f32 %v158_v8, %v129_v11 }
 0x107   :  { %139 = vst.msk [vmem:[#allocation7 + $0x8] sm:$0xff] %vm56_vm0, %v135_v10 }
 0x108   :  { %138 = vst.msk [vmem:[#allocation7] sm:$0xff] %vm56_vm0, %v130_v12 }
 0x109   :  { %246 = shalt.err (!%p243_p6)
}
 0x10a   :  { %s247_s15 = scalar_lea.hbm %s343_s3, 256 }
 0x10b   :  { %p248_p7 = scmp.ne.s32.totalorder %s343_s3, %s247_s15  ;;  %p251_p8 = scmp.lt.u32.totalorder %s247_s15, %s343_s3 }
 0x10d   :  { %p253_p9 = pnand %p251_p8, %p248_p7 }
 0x10f   :  { %256 = shalt.err (!%p253_p9)
}
 0x110   :  { %151 = dma.vmem_to_hbm [thread:$0]  %s146_s12, 256, %s343_s3, [#allocation4], %s264_s22, %s264_s22, %s265_s23  }
 0x111   :  { %261 = dma.done.wait [#allocation4], 256  }
 0x112   :  { %262 = vsyncadd [#allocation4], 4294967040 }
 0x113   :  { %155 = vsyncpa [#allocation3], 1 }
 0x114   :  { %156 = vsyncpa [#allocation6], 1 }
 0x115   :  { %157 = vsyncpa [#allocation4], 1 }

</bundles_post_ra>
